<compile_context>
chip_gen: v7x
topology: tpu7x:2x2x1
jax: 0.10.0
libtpu: 0.0.40
codegen_flags: <defaults>
</compile_context>

<pallas_src>
import functools
import math

import jax
import jax.numpy as jnp
from jax.experimental import pallas as pl
from jax.experimental.pallas import tpu as pltpu

LANE = 128


def _round_up(x, m):
    return (x + m - 1) // m * m


def dqn_kernel(x_ref, w1_ref, b1_ref, w2_ref, b2_ref, w3_ref, b3_ref, out_ref,
               *, n_actions):
    # fc1 + ReLU: state arrives f32; cast to bf16 in-kernel (free under the
    # mem-bound regime), MXU accumulates in f32, bias/ReLU in f32 on the VPU.
    x = x_ref[...].astype(jnp.bfloat16)
    h1 = jnp.dot(x, w1_ref[...], preferred_element_type=jnp.float32)
    h1 = jnp.maximum(h1 + b1_ref[...], 0.0).astype(jnp.bfloat16)
    # fc2 + ReLU
    h2 = jnp.dot(h1, w2_ref[...], preferred_element_type=jnp.float32)
    h2 = jnp.maximum(h2 + b2_ref[...], 0.0).astype(jnp.bfloat16)
    # fc3: MXU runs on the lane-padded (128-wide) w3; only the first n_actions
    # columns are stored, so the HBM writeback is n_actions-wide (masked store,
    # hidden since the kernel is bandwidth-bound, not vst-slot-bound).
    q = jnp.dot(h2, w3_ref[...], preferred_element_type=jnp.float32)
    out_ref[...] = (q[:, :n_actions] + b3_ref[...]).astype(out_ref.dtype)


def prepare_params(params):
    """Pad hidden feature dims to multiples of 128 (lane-dense) and cast
    weights to bf16. Zero-padding weights+biases keeps padded lanes exactly 0
    through the ReLUs, so the math is unchanged. b3 stays unpadded (1, n_actions)
    since the kernel slices Q to n_actions before the bias-add/store.
    Biases stay f32 (VPU bias-add in f32). Returns (prepared_params, n_actions).
    """
    in_dim, fc1 = params["w1"].shape
    fc2 = params["w2"].shape[1]
    n_actions = params["w3"].shape[1]
    fc1_p = _round_up(fc1, LANE)
    fc2_p = _round_up(fc2, LANE)
    act_p = _round_up(n_actions, LANE)

    def pad2(a, rows, cols):
        return jnp.pad(a, ((0, rows - a.shape[0]), (0, cols - a.shape[1])))

    prepared = {
        "w1": pad2(params["w1"], in_dim, fc1_p).astype(jnp.bfloat16),
        "b1": pad2(params["b1"], 1, fc1_p).astype(jnp.float32),
        "w2": pad2(params["w2"], fc1_p, fc2_p).astype(jnp.bfloat16),
        "b2": pad2(params["b2"], 1, fc2_p).astype(jnp.float32),
        "w3": pad2(params["w3"], fc2_p, act_p).astype(jnp.bfloat16),
        "b3": params["b3"].astype(jnp.float32),  # (1, n_actions), unpadded
    }
    return prepared, n_actions


@functools.partial(jax.jit, static_argnums=(2,))
def deep_q_network_forward(state, prepared, n_actions):
    """DQN forward pass in one Pallas TPU kernel.

    state:     [batch, input_dim] float32
    prepared:  output of prepare_params (bf16 weights, f32 biases, lane-padded)
    returns:   [batch, n_actions] float32 Q-values
    """
    batch, in_dim = state.shape
    fc1_p = prepared["w1"].shape[1]
    fc2_p = prepared["w2"].shape[1]
    act_p = prepared["w3"].shape[1]

    # Batch tile: 256 = one full MXU pass on v6e/v7x (2x256^2) and 2x128 passes
    # on v5e; keeps grid >= 2 for batch >= 512 (v7x dual-TC sharding + DMA/MXU
    # overlap) and caps batch over-padding. Small batches: single tile rounded
    # up to a multiple of 16.
    tm = 256 if batch >= 256 else _round_up(batch, 16)
    padded_batch = _round_up(batch, tm)

    x = state
    if padded_batch != batch:
        x = jnp.pad(x, ((0, padded_batch - batch), (0, 0)))

    # Weights/biases: same block every grid step -> DMA'd once, VMEM-resident.
    def resident(a):
        return pl.BlockSpec(a.shape, lambda i: (0, 0))

    weight_bytes = (in_dim * fc1_p + fc1_p * fc2_p + fc2_p * act_p) * 2  # bf16
    bias_bytes = (fc1_p + fc2_p + n_actions) * 4                         # f32
    cost = pl.CostEstimate(
        flops=2 * padded_batch * (in_dim * fc1_p + fc1_p * fc2_p + fc2_p * act_p),
        transcendentals=0,
        bytes_accessed=(padded_batch * in_dim * 4          # x (f32 read)
                        + padded_batch * n_actions * 4     # Q out (f32 write)
                        + weight_bytes + bias_bytes),
    )

    out = pl.pallas_call(
        functools.partial(dqn_kernel, n_actions=n_actions),
        out_shape=jax.ShapeDtypeStruct((padded_batch, n_actions), jnp.float32),
        grid=(padded_batch // tm,),
        in_specs=[
            pl.BlockSpec((tm, in_dim), lambda i: (i, 0)),   # activation tile streams
            resident(prepared["w1"]), resident(prepared["b1"]),
            resident(prepared["w2"]), resident(prepared["b2"]),
            resident(prepared["w3"]), resident(prepared["b3"]),
        ],
        out_specs=pl.BlockSpec((tm, n_actions), lambda i: (i, 0)),
        compiler_params=pltpu.CompilerParams(
            dimension_semantics=("parallel",),  # v7x: shard batch tiles across both TCs
        ),
        cost_estimate=cost,
    )(x, prepared["w1"], prepared["b1"], prepared["w2"], prepared["b2"],
      prepared["w3"], prepared["b3"])

    return out[:batch] if padded_batch != batch else out


def init_params(key, input_dim, fc1_dims, fc2_dims, n_actions):
    """Deterministic init mirroring torch.nn.Linear default:
    U(-1/sqrt(fan_in), 1/sqrt(fan_in)) for both weight and bias."""
    def linear(k, fan_in, fan_out):
        kw, kb = jax.random.split(k)
        bound = 1.0 / math.sqrt(fan_in)
        w = jax.random.uniform(kw, (fan_in, fan_out), jnp.float32, -bound, bound)
        b = jax.random.uniform(kb, (1, fan_out), jnp.float32, -bound, bound)
        return w, b

    k1, k2, k3 = jax.random.split(key, 3)
    w1, b1 = linear(k1, input_dim, fc1_dims)
    w2, b2 = linear(k2, fc1_dims, fc2_dims)
    w3, b3 = linear(k3, fc2_dims, n_actions)
    return {"w1": w1, "b1": b1, "w2": w2, "b2": b2, "w3": w3, "b3": b3}


def reference_forward(state, p):
    h1 = jnp.maximum(state @ p["w1"] + p["b1"], 0.0)
    h2 = jnp.maximum(h1 @ p["w2"] + p["b2"], 0.0)
    return h2 @ p["w3"] + p["b3"]


if __name__ == "__main__":
    # Small shapes consistent with DeepQNetwork(lr, input_dims=(32,), fc1_dims=64,
    # fc2_dims=64, n_actions=4): state is [batch, 32].
    batch, input_dim, fc1_dims, fc2_dims, n_actions = 8, 32, 64, 64, 4

    key = jax.random.PRNGKey(0)
    k_state, k_params = jax.random.split(key)
    state = jax.random.normal(k_state, (batch, input_dim), jnp.float32)
    params = init_params(k_params, input_dim, fc1_dims, fc2_dims, n_actions)

    prepared, n_act = prepare_params(params)
    actions = deep_q_network_forward(state, prepared, n_act)
    actions = jax.block_until_ready(actions)

    # Correctness check against a pure-JAX f32 reference of the same math.
    # Tolerance loosened vs. f32 because the kernel uses bf16 MXU inputs
    # (f32 accumulation). If this forward is reused inside the TD-loss/gradient
    # path, keep weights in f32 instead (compute is free; kernel is mem-bound).
    expected = reference_forward(state, params)
    assert actions.shape == (batch, n_actions)
    assert jnp.allclose(actions, expected, atol=3e-2, rtol=3e-2)

    print("KERNEL_OK")
</pallas_src>

<mosaic_0001>
module attributes {stable_mosaic.version = 11 : i64} {
  func.func @dqn_kernel(%arg0: i32, %arg1: memref<16x32xf32, #tpu.memory_space<vmem>>, %arg2: memref<32x128xbf16, #tpu.memory_space<vmem>>, %arg3: memref<1x128xf32, #tpu.memory_space<vmem>>, %arg4: memref<128x128xbf16, #tpu.memory_space<vmem>>, %arg5: memref<1x128xf32, #tpu.memory_space<vmem>>, %arg6: memref<128x128xbf16, #tpu.memory_space<vmem>>, %arg7: memref<1x4xf32, #tpu.memory_space<vmem>>, %arg8: memref<16x4xf32, #tpu.memory_space<vmem>>) attributes {dimension_semantics = [#tpu.dimension_semantics<parallel>], iteration_bounds = array<i64: 1>, scalar_prefetch = 0 : i64, scratch_operands = 0 : i64, tpu.core_type = #tpu.core_type<tc>, window_params = [{transform_indices = @transform_0, window_bounds = array<i64: 16, 32>}, {pipeline_mode = #tpu.pipeline_mode<synchronous>, transform_indices = @transform_1, window_bounds = array<i64: 32, 128>}, {pipeline_mode = #tpu.pipeline_mode<synchronous>, transform_indices = @transform_2, window_bounds = array<i64: 1, 128>}, {pipeline_mode = #tpu.pipeline_mode<synchronous>, transform_indices = @transform_3, window_bounds = array<i64: 128, 128>}, {pipeline_mode = #tpu.pipeline_mode<synchronous>, transform_indices = @transform_4, window_bounds = array<i64: 1, 128>}, {pipeline_mode = #tpu.pipeline_mode<synchronous>, transform_indices = @transform_5, window_bounds = array<i64: 128, 128>}, {pipeline_mode = #tpu.pipeline_mode<synchronous>, transform_indices = @transform_6, window_bounds = array<i64: 1, 4>}, {transform_indices = @transform_7, window_bounds = array<i64: 16, 4>}]} {
    %c0 = arith.constant 0 : index
    %c0_0 = arith.constant 0 : index
    %0 = vector.load %arg1[%c0, %c0_0] : memref<16x32xf32, #tpu.memory_space<vmem>>, vector<16x32xf32>
    %1 = arith.truncf %0 : vector<16x32xf32> to vector<16x32xbf16>
    %c0_1 = arith.constant 0 : index
    %c0_2 = arith.constant 0 : index
    %2 = vector.load %arg2[%c0_1, %c0_2] : memref<32x128xbf16, #tpu.memory_space<vmem>>, vector<32x128xbf16>
    %cst = arith.constant dense<0.000000e+00> : vector<16x128xf32>
    %3 = tpu.matmul %1, %2, %cst {dimension_numbers = #tpu.dot_dimension_numbers<[1], [0], [0], [1], [0, 0, 1, 1], [], []>} : vector<16x32xbf16>, vector<32x128xbf16>, vector<16x128xf32> -> vector<16x128xf32>
    %c0_3 = arith.constant 0 : index
    %c0_4 = arith.constant 0 : index
    %4 = vector.load %arg3[%c0_3, %c0_4] : memref<1x128xf32, #tpu.memory_space<vmem>>, vector<1x128xf32>
    %5 = vector.broadcast %4 : vector<1x128xf32> to vector<16x128xf32>
    %6 = arith.addf %3, %5 : vector<16x128xf32>
    %cst_5 = arith.constant 0.000000e+00 : f32
    %7 = vector.broadcast %cst_5 : f32 to vector<16x128xf32>
    %8 = arith.maximumf %6, %7 : vector<16x128xf32>
    %9 = arith.truncf %8 : vector<16x128xf32> to vector<16x128xbf16>
    %c0_6 = arith.constant 0 : index
    %c0_7 = arith.constant 0 : index
    %10 = vector.load %arg4[%c0_6, %c0_7] : memref<128x128xbf16, #tpu.memory_space<vmem>>, vector<128x128xbf16>
    %cst_8 = arith.constant dense<0.000000e+00> : vector<16x128xf32>
    %11 = tpu.matmul %9, %10, %cst_8 {dimension_numbers = #tpu.dot_dimension_numbers<[1], [0], [0], [1], [0, 0, 1, 1], [], []>} : vector<16x128xbf16>, vector<128x128xbf16>, vector<16x128xf32> -> vector<16x128xf32>
    %c0_9 = arith.constant 0 : index
    %c0_10 = arith.constant 0 : index
    %12 = vector.load %arg5[%c0_9, %c0_10] : memref<1x128xf32, #tpu.memory_space<vmem>>, vector<1x128xf32>
    %13 = vector.broadcast %12 : vector<1x128xf32> to vector<16x128xf32>
    %14 = arith.addf %11, %13 : vector<16x128xf32>
    %cst_11 = arith.constant 0.000000e+00 : f32
    %15 = vector.broadcast %cst_11 : f32 to vector<16x128xf32>
    %16 = arith.maximumf %14, %15 : vector<16x128xf32>
    %17 = arith.truncf %16 : vector<16x128xf32> to vector<16x128xbf16>
    %c0_12 = arith.constant 0 : index
    %c0_13 = arith.constant 0 : index
    %18 = vector.load %arg6[%c0_12, %c0_13] : memref<128x128xbf16, #tpu.memory_space<vmem>>, vector<128x128xbf16>
    %cst_14 = arith.constant dense<0.000000e+00> : vector<16x128xf32>
    %19 = tpu.matmul %17, %18, %cst_14 {dimension_numbers = #tpu.dot_dimension_numbers<[1], [0], [0], [1], [0, 0, 1, 1], [], []>} : vector<16x128xbf16>, vector<128x128xbf16>, vector<16x128xf32> -> vector<16x128xf32>
    %20 = vector.extract_strided_slice %19 {offsets = [0, 0], sizes = [16, 4], strides = [1, 1]} : vector<16x128xf32> to vector<16x4xf32>
    %c0_15 = arith.constant 0 : index
    %c0_16 = arith.constant 0 : index
    %21 = vector.load %arg7[%c0_15, %c0_16] : memref<1x4xf32, #tpu.memory_space<vmem>>, vector<1x4xf32>
    %22 = vector.broadcast %21 : vector<1x4xf32> to vector<16x4xf32>
    %23 = arith.addf %20, %22 : vector<16x4xf32>
    %c0_17 = arith.constant 0 : index
    %c0_18 = arith.constant 0 : index
    %24 = vector.load %arg8[%c0_17, %c0_18] : memref<16x4xf32, #tpu.memory_space<vmem>>, vector<16x4xf32>
    tpu.vector_store %arg8[%c0_17, %c0_18], %23 {strides = array<i32>} : memref<16x4xf32, #tpu.memory_space<vmem>>, vector<16x4xf32>,
    return
  }
  func.func @transform_0(%arg0: i32) -> (i32, i32) {
    %c0_i32 = arith.constant 0 : i32
    %c0_i32_0 = arith.constant 0 : i32
    return %arg0, %c0_i32 : i32, i32
  }
  func.func @transform_1(%arg0: i32) -> (i32, i32) {
    %c0_i32 = arith.constant 0 : i32
    %c0_i32_0 = arith.constant 0 : i32
    %c0_i32_1 = arith.constant 0 : i32
    return %c0_i32, %c0_i32_0 : i32, i32
  }
  func.func @transform_2(%arg0: i32) -> (i32, i32) {
    %c0_i32 = arith.constant 0 : i32
    %c0_i32_0 = arith.constant 0 : i32
    %c0_i32_1 = arith.constant 0 : i32
    return %c0_i32, %c0_i32_0 : i32, i32
  }
  func.func @transform_3(%arg0: i32) -> (i32, i32) {
    %c0_i32 = arith.constant 0 : i32
    %c0_i32_0 = arith.constant 0 : i32
    %c0_i32_1 = arith.constant 0 : i32
    return %c0_i32, %c0_i32_0 : i32, i32
  }
  func.func @transform_4(%arg0: i32) -> (i32, i32) {
    %c0_i32 = arith.constant 0 : i32
    %c0_i32_0 = arith.constant 0 : i32
    %c0_i32_1 = arith.constant 0 : i32
    return %c0_i32, %c0_i32_0 : i32, i32
  }
  func.func @transform_5(%arg0: i32) -> (i32, i32) {
    %c0_i32 = arith.constant 0 : i32
    %c0_i32_0 = arith.constant 0 : i32
    %c0_i32_1 = arith.constant 0 : i32
    return %c0_i32, %c0_i32_0 : i32, i32
  }
  func.func @transform_6(%arg0: i32) -> (i32, i32) {
    %c0_i32 = arith.constant 0 : i32
    %c0_i32_0 = arith.constant 0 : i32
    %c0_i32_1 = arith.constant 0 : i32
    return %c0_i32, %c0_i32_0 : i32, i32
  }
  func.func @transform_7(%arg0: i32) -> (i32, i32) {
    %c0_i32 = arith.constant 0 : i32
    %c0_i32_0 = arith.constant 0 : i32
    return %arg0, %c0_i32 : i32, i32
  }
}

</mosaic_0001>

<bundles_post_ra>
// kernel: deep_q_network_forward.1
= control target key start
LH: loop header
LB: loop body
LE: loop exit
PB: predicated region body
PF: predicated region fallthrough
CT: control target
= control target key end

     0   :  { %12 = vsyncpa [#allocation3], 0  ;;  %s651_s0 = inlined_call_operand.vmem [shape: f32[16,32], index: 0, kind: input, shape index: {}]   ;;  %s652_s1 = inlined_call_operand.vmem [shape: bf16[32,128], index: 1, kind: input, shape index: {}]   ;;  %s653_s2 = inlined_call_operand.vmem [shape: f32[1,128], index: 2, kind: input, shape index: {}]   ;;  %s654_s3 = inlined_call_operand.hbm [shape: bf16[128,128], index: 3, kind: input, shape index: {}]   ;;  %s655_s4 = inlined_call_operand.vmem [shape: f32[1,128], index: 4, kind: input, shape index: {}]   ;;  %s656_s5 = inlined_call_operand.hbm [shape: bf16[128,128], index: 5, kind: input, shape index: {}]   ;;  %s657_s6 = inlined_call_operand.vmem [shape: f32[1,4], index: 6, kind: input, shape index: {}]   ;;  %s658_s7 = inlined_call_operand.vmem [shape: f32[16,4], index: 7, kind: output, shape index: {}]  }
   0x1   :  { %13 = vsyncpa [#allocation5], 0  ;;  %s530_s24 = smov [#allocation2]   ;;  %s482_s28 = scalar_lea.hbm %s654_s3, 1024 }
   0x2   :  { %s25_s25 = sshll.u32 %s530_s24, 4  ;;  %p483_p0 = scmp.ne.s32.totalorder %s654_s3, %s482_s28  ;;  %s26_s25 = int_to_ptr.vmem [resolvable:$true] %s25_s25 }
   0x3   :  { %p486_p1 = scmp.lt.u32.totalorder %s482_s28, %s654_s3 }
   0x5   :  { %p488_p2 = pnand %p486_p1, %p483_p0 }
   0x7   :  { %491 = shalt.err (!%p488_p2)
}
   0x8   :  { %s492_s10 = scalar_lea.vmem %s26_s25, 1024  ;;  %p497_p4 = scmp.lt.s32.totalorder %s26_s25, %s26_s25 }
   0x9   :  { %p493_p3 = scmp.ne.s32.totalorder %s26_s25, %s492_s10  ;;  %p498_p5 = scmp.lt.s32.totalorder %s492_s10, %s492_s10 }
   0xb   :  { %p499_p6 = por %p498_p5, %p497_p4 }
   0xd   :  { %p500_p7 = pnand %p499_p6, %p493_p3 }
   0xf   :  { %503 = shalt.err (!%p500_p7)
}
  0x10   :  { %s531_s11 = smov 64   ;;  %s532_s12 = smov 4  }
  0x11   :  { %31 = dma.hbm_to_vmem [thread:$0]  %s654_s3, 1024, %s26_s25, [#allocation3], %s531_s11, %s531_s11, %s532_s12  }
  0x12   :  { %s533_s15 = smov [#allocation4]   ;;  %s504_s19 = scalar_lea.hbm %s656_s5, 1024 }
  0x13   :  { %s39_s16 = sshll.u32 %s533_s15, 4  ;;  %p505_p8 = scmp.ne.s32.totalorder %s656_s5, %s504_s19  ;;  %s40_s16 = int_to_ptr.vmem [resolvable:$true] %s39_s16 }
  0x14   :  { %p508_p9 = scmp.lt.u32.totalorder %s504_s19, %s656_s5 }
  0x16   :  { %p510_p10 = pnand %p508_p9, %p505_p8 }
  0x18   :  { %513 = shalt.err (!%p510_p10)
}
  0x19   :  { %s514_s24 = scalar_lea.vmem %s40_s16, 1024  ;;  %p519_p12 = scmp.lt.s32.totalorder %s40_s16, %s40_s16 }
  0x1a   :  { %p515_p11 = scmp.ne.s32.totalorder %s40_s16, %s514_s24  ;;  %p520_p13 = scmp.lt.s32.totalorder %s514_s24, %s514_s24 }
  0x1c   :  { %p521_p0 = por %p520_p13, %p519_p12 }
  0x1e   :  { %p522_p1 = pnand %p521_p0, %p515_p11 }
  0x20   :  { %525 = shalt.err (!%p522_p1)
}
  0x21   :  { %45 = dma.hbm_to_vmem [thread:$0]  %s656_s5, 1024, %s40_s16, [#allocation5], %s531_s11, %s531_s11, %s532_s12  }
  0x22   :  { %526 = dma.done.wait [#allocation3], 1024  }
  0x23   :  { %527 = vsyncadd [#allocation3], 4294966272 }
  0x24   :  { %528 = dma.done.wait [#allocation5], 1024  }
  0x25   :  { %529 = vsyncadd [#allocation5], 4294966272  ;;  %v534_v0 = vmov 0.0   ;;  %vm535_vm0 = vmmov 0   ;;  %v464_v1 = vld [vmem:[%s652_s1] sm:$0xff]   ;;  %v465_v2 = vld [vmem:[%s652_s1 + $0x8] sm:$0xff]  }
  0x26   :  { %410 = vmatprep.subr.bf16.mxu0 %v534_v0  ;;  %414 = vmatprep.mubr.msk.bf16.mxu0 %vm535_vm0, %v534_v0  ;;  %v55_v3 = vld [vmem:[%s651_s0] sm:$0xff]  ;;  %v56_v4 = vld [vmem:[%s651_s0 + $0x8] sm:$0xff]  ;;  %v466_v5 = vld [vmem:[#allocation2] sm:$0xff]   ;;  %vm81_vm1 = vcmask 261120   ;;  %vm358_vm2 = vcmask 31744  }
  0x27   :  { %418 = vmatprep.subr.bf16.mxu1 %v534_v0  ;;  %434 = vmatprep.mubr.msk.bf16.mxu1 %vm535_vm0, %v534_v0  ;;  %v57_v6 = vpack.c.bf16 %v56_v4, %v55_v3  ;;  %v467_v7 = vld [vmem:[#allocation2 + $0x8] sm:$0xff]   ;;  %v468_v8 = vld [vmem:[#allocation2 + $0x10] sm:$0xff]   ;;  %v469_v9 = vld [vmem:[#allocation2 + $0x18] sm:$0xff]  }
  0x28   :  { %411 = vmatpush3.bf16.msra.mxu0 %v464_v1  ;;  %419 = vmatpush3.bf16.msra.mxu1 %v466_v5  ;;  %v470_v10 = vld [vmem:[#allocation2 + $0x20] sm:$0xff]   ;;  %v471_v11 = vld [vmem:[#allocation2 + $0x28] sm:$0xff]   ;;  %v472_v12 = vld [vmem:[#allocation2 + $0x30] sm:$0xff]  }
  0x29   :  { %412 = vmatprep.subr.bf16.mxu0 %v534_v0  ;;  %420 = vmatprep.subr.bf16.mxu1 %v534_v0  ;;  %v473_v13 = vld [vmem:[#allocation2 + $0x38] sm:$0xff]   ;;  %v474_v14 = vld [vmem:[#allocation4] sm:$0xff]   ;;  %v475_v15 = vld [vmem:[#allocation4 + $0x8] sm:$0xff]  }
  0x2a   :  { %v476_v16 = vld [vmem:[#allocation4 + $0x10] sm:$0xff]   ;;  %v477_v17 = vld [vmem:[#allocation4 + $0x18] sm:$0xff]   ;;  %v478_v18 = vld [vmem:[#allocation4 + $0x20] sm:$0xff]  }
  0x2b   :  { %v479_v19 = vld [vmem:[#allocation4 + $0x28] sm:$0xff]   ;;  %v367_v20 = vld [vmem:[%s653_s2] ss:$0 sm:$0xff]  ;;  %v481_v31 = vld [vmem:[#allocation4 + $0x38] sm:$0xff]  }
  0x2c   :  { %413 = vmatpush3.bf16.msra.mxu0 %v465_v2  ;;  %421 = vmatpush3.bf16.msra.mxu1 %v467_v7  ;;  %v480_v30 = vld [vmem:[#allocation4 + $0x30] sm:$0xff]  }
  0x2d   :  { %438 = vmatprep.subr.bf16.mxu0 %v534_v0  ;;  %422 = vmatprep.subr.bf16.mxu1 %v534_v0  ;;  %v371_v32 = vld [vmem:[%s655_s4] ss:$0 sm:$0xff] }
  0x2e   :  { %v388_v42 = vld [vmem:[%s657_s6] ss:$0 sm:$0xff] }
  0x2f   :  { %415 = vmatmul.mubr.msk.bf16.vlgmr.msra.gmra.mrb[0].mxu0 %vm81_vm1, %v57_v6 }
  0x30   :  { %454 = vmatprep.mubr.msk.bf16.mxu0 %vm535_vm0, %v534_v0  ;;  %423 = vmatpush3.bf16.msra.mxu1 %v468_v8 }
  0x31   :  { %424 = vmatprep.subr.bf16.mxu1 %v534_v0  ;;  %439 = vmatpush3.bf16.msra.mxu0 %v474_v14 }
  0x32   :  { %440 = vmatprep.subr.bf16.mxu0 %v534_v0 }
  0x34   :  { %425 = vmatpush3.bf16.msra.mxu1 %v469_v9 }
  0x35   :  { %426 = vmatprep.subr.bf16.mxu1 %v534_v0  ;;  %441 = vmatpush3.bf16.msra.mxu0 %v475_v15 }
  0x36   :  { %442 = vmatprep.subr.bf16.mxu0 %v534_v0 }
  0x38   :  { %427 = vmatpush3.bf16.msra.mxu1 %v470_v10 }
  0x39   :  { %428 = vmatprep.subr.bf16.mxu1 %v534_v0  ;;  %443 = vmatpush3.bf16.msra.mxu0 %v476_v16 }
  0x3a   :  { %444 = vmatprep.subr.bf16.mxu0 %v534_v0 }
  0x3c   :  { %429 = vmatpush3.bf16.msra.mxu1 %v471_v11 }
  0x3d   :  { %430 = vmatprep.subr.bf16.mxu1 %v534_v0  ;;  %445 = vmatpush3.bf16.msra.mxu0 %v477_v17 }
  0x3e   :  { %446 = vmatprep.subr.bf16.mxu0 %v534_v0 }
  0x40   :  { %431 = vmatpush3.bf16.msra.mxu1 %v472_v12 }
  0x41   :  { %432 = vmatprep.subr.bf16.mxu1 %v534_v0  ;;  %447 = vmatpush3.bf16.msra.mxu0 %v478_v18 }
  0x42   :  { %448 = vmatprep.subr.bf16.mxu0 %v534_v0 }
  0x44   :  { %433 = vmatpush3.bf16.msra.mxu1 %v473_v13 }
  0x45   :  { %449 = vmatpush3.bf16.msra.mxu0 %v479_v19 }
  0x46   :  { %450 = vmatprep.subr.bf16.mxu0 %v534_v0 }
  0x49   :  { %451 = vmatpush3.bf16.msra.mxu0 %v480_v30 }
  0x4a   :  { %452 = vmatprep.subr.bf16.mxu0 %v534_v0 }
  0x4d   :  { %453 = vmatpush3.bf16.msra.mxu0 %v481_v31 }
 0x102   :  { %v119_v21 = vpop.f32.mrb[0].mxu0 }
 0x103   :  { %v120_v22 = vadd.f32 %v367_v20, %v119_v21  ;;  %v416_v23 = vpop.f32.mrb[1].mxu0 }
 0x104   :  { %v122_v24 = vpop.f32.mrb[2].mxu0 }
 0x105   :  { %v123_v25 = vadd.f32 %v367_v20, %v122_v24  ;;  %v417_v26 = vpop.f32.mrb[3].mxu0  ;;  %v126_v27 = vmax.f32 %v120_v22, 0.0 }
 0x107   :  { %v127_v28 = vmax.f32 %v123_v25, 0.0 }
 0x109   :  { %v128_v29 = vpack.c.bf16 %v127_v28, %v126_v27 }
 0x10b   :  { %435 = vmatmul.mubr.bf16.vlgmr.msra.gmra.mrb[0].mxu1 %v128_v29 }
 0x1de   :  { %v234_v33 = vpop.f32.mrb[0].mxu1 }
 0x1df   :  { %v235_v34 = vadd.f32 %v371_v32, %v234_v33  ;;  %v436_v35 = vpop.f32.mrb[1].mxu1 }
 0x1e0   :  { %v237_v36 = vpop.f32.mrb[2].mxu1 }
 0x1e1   :  { %v238_v37 = vadd.f32 %v371_v32, %v237_v36  ;;  %v437_v38 = vpop.f32.mrb[3].mxu1  ;;  %v241_v39 = vmax.f32 %v235_v34, 0.0 }
 0x1e3   :  { %v242_v40 = vmax.f32 %v238_v37, 0.0 }
 0x1e5   :  { %v243_v41 = vpack.c.bf16 %v242_v40, %v241_v39 }
 0x1e7   :  { %455 = vmatmul.mubr.bf16.vlgmr.msra.gmra.mrb[4].mxu0 %v243_v41 }
 0x2ba   :  { %v342_v43 = vpop.f32.mrb[4].mxu0 }
 0x2bb   :  { %v356_v44 = vadd.f32 %v388_v42, %v342_v43  ;;  %v456_v45 = vpop.f32.mrb[5].mxu0 }
 0x2bc   :  { %v345_v46 = vpop.f32.mrb[6].mxu0 }
 0x2bd   :  { %359 = vst.msk [vmem:[%s658_s7] sm:$0xff] %vm358_vm2, %v356_v44  ;;  %v357_v47 = vadd.f32 %v388_v42, %v345_v46  ;;  %v457_v48 = vpop.f32.mrb[7].mxu0 }
 0x2bf   :  { %360 = vst.msk [vmem:[%s658_s7 + $0x8] sm:$0xff] %vm358_vm2, %v357_v47 }
 0x2c0   :  { %365 = vsyncpa [#allocation3], 1 }
 0x2c1   :  { %366 = vsyncpa [#allocation5], 1 }

</bundles_post_ra>
